<compile_context>
chip_gen: v5e
topology: v5e:2x2
jax: 0.10.0
libtpu: 0.0.40
codegen_flags: <defaults>
</compile_context>

<pallas_src>
import functools

import jax
import jax.numpy as jnp
from jax.experimental import pallas as pl
from jax.experimental.pallas import tpu as pltpu

EPS = 1e-5


def _round_up(a, b):
    return ((a + b - 1) // b) * b


# ----------------------------------------------------------------------------
# Kernel 1: conv-as-matmul + bias + ReLU + fused per-tile BN statistics.
# ----------------------------------------------------------------------------
def _conv_relu_stats_kernel(p_ref, w_ref, b_ref, y_ref, s_ref, *, m_real):
    i = pl.program_id(0)
    tm = y_ref.shape[0]

    acc = jnp.dot(p_ref[...], w_ref[...], preferred_element_type=jnp.float32)
    acc = jnp.maximum(acc + b_ref[...], 0.0)        # bias broadcast + ReLU
    y_ref[...] = acc                                # lane-dense (tm, 128) store

    # Mask out padded rows (beyond the real M) before accumulating statistics.
    row = i * tm + jax.lax.broadcasted_iota(jnp.int32, (tm, 1), 0)
    yv = jnp.where(row < m_real, acc, 0.0)
    sums = jnp.sum(yv, axis=0, keepdims=True)       # (1, Cp)
    sqs = jnp.sum(yv * yv, axis=0, keepdims=True)   # (1, Cp)
    s_ref[...] = jnp.concatenate([sums, sqs], axis=0)[None]   # (1, 2, Cp)


def _conv_relu_stats(patches, w_mat, bias, *, m_real, tm):
    Mp, Kp = patches.shape
    Cp = w_mat.shape[1]
    ntiles = Mp // tm
    kernel = functools.partial(_conv_relu_stats_kernel, m_real=m_real)
    return pl.pallas_call(
        kernel,
        out_shape=(
            jax.ShapeDtypeStruct((Mp, Cp), jnp.float32),
            jax.ShapeDtypeStruct((ntiles, 2, Cp), jnp.float32),
        ),
        grid_spec=pltpu.PrefetchScalarGridSpec(
            num_scalar_prefetch=0,
            grid=(ntiles,),
            in_specs=[
                pl.BlockSpec((tm, Kp), lambda i: (i, 0)),
                pl.BlockSpec((Kp, Cp), lambda i: (0, 0)),   # resident weight tile
                pl.BlockSpec((1, Cp), lambda i: (0, 0)),    # resident bias row
            ],
            out_specs=[
                pl.BlockSpec((tm, Cp), lambda i: (i, 0)),
                pl.BlockSpec((1, 2, Cp), lambda i: (i, 0, 0)),
            ],
        ),
        compiler_params=pltpu.CompilerParams(
            dimension_semantics=("parallel",)),        # megacore shard on v7x
    )(patches, w_mat, bias)


# ----------------------------------------------------------------------------
# Kernel 2: BatchNorm normalize = per-channel scale/shift, tiled over M.
# ----------------------------------------------------------------------------
def _bn_scale_shift_kernel(y_ref, sc_ref, sh_ref, o_ref):
    o_ref[...] = y_ref[...] * sc_ref[...] + sh_ref[...]


def _bn_scale_shift(y, scale, shift, *, tm):
    Mp, Cp = y.shape
    return pl.pallas_call(
        _bn_scale_shift_kernel,
        out_shape=jax.ShapeDtypeStruct((Mp, Cp), jnp.float32),
        grid_spec=pltpu.PrefetchScalarGridSpec(
            num_scalar_prefetch=0,
            grid=(Mp // tm,),
            in_specs=[
                pl.BlockSpec((tm, Cp), lambda i: (i, 0)),
                pl.BlockSpec((1, Cp), lambda i: (0, 0)),
                pl.BlockSpec((1, Cp), lambda i: (0, 0)),
            ],
            out_specs=pl.BlockSpec((tm, Cp), lambda i: (i, 0)),
        ),
        compiler_params=pltpu.CompilerParams(
            dimension_semantics=("parallel",)),
    )(y, scale, shift)


# ----------------------------------------------------------------------------
# Wrapper: im2col (glue), Pallas hot path, back to NCHW.
# ----------------------------------------------------------------------------
@functools.partial(jax.jit, static_argnames=("tm",))
def convolution_block(x, w, b, gamma, beta, *, tm=512):
    """x: [N, Cin, H, W] f32; w: [Cout, Cin, 4, 4]; b/gamma/beta: [Cout]."""
    N, Cin, H, W = x.shape
    Cout = w.shape[0]
    kh = kw = 4
    stride = 2
    Ho = (H + 2 - kh) // stride + 1
    Wo = (W + 2 - kw) // stride + 1
    M = N * Ho * Wo
    K = Cin * kh * kw

    # im2col (pure data rearrangement, kept in plain JAX).
    # TODO(synk): move the patch gather into the kernel (x via pl.ANY + manual
    # strided DMA) to avoid materializing the 16x-expanded patches array in HBM.
    xpad = jnp.pad(x, ((0, 0), (0, 0), (1, 1), (1, 1)))
    cols = []
    for ih in range(kh):
        for iw in range(kw):
            cols.append(xpad[:, :, ih:ih + stride * Ho:stride,
                                   iw:iw + stride * Wo:stride])
    patches = jnp.stack(cols, axis=2)                        # [N, Cin, 16, Ho, Wo]
    patches = patches.transpose(0, 3, 4, 1, 2).reshape(M, K)

    # Lane-dense padding: K -> mult. of 128, Cout -> mult. of 128, M -> mult. of tile.
    Kp = _round_up(K, 128)
    Cp = _round_up(Cout, 128)
    tm_eff = min(tm, _round_up(M, 8))
    Mp = _round_up(M, tm_eff)

    patches = jnp.pad(patches.astype(jnp.float32), ((0, Mp - M), (0, Kp - K)))
    w_mat = jnp.pad(w.reshape(Cout, K).T.astype(jnp.float32),
                    ((0, Kp - K), (0, Cp - Cout)))           # [Kp, Cp]
    bias = jnp.pad(b.astype(jnp.float32), (0, Cp - Cout)).reshape(1, Cp)
    gamma_p = jnp.pad(gamma.astype(jnp.float32), (0, Cp - Cout))
    beta_p = jnp.pad(beta.astype(jnp.float32), (0, Cp - Cout))

    # Kernel 1: matmul + bias + ReLU + per-tile BN stats (single pass over y write).
    y, stats = _conv_relu_stats(patches, w_mat, bias, m_real=M, tm=tm_eff)

    # Tiny stats reduction + BN fold (plain JAX, O(Cp) work).
    totals = jnp.sum(stats, axis=0)                          # (2, Cp)
    mean = totals[0] / M
    var = jnp.maximum(totals[1] / M - mean * mean, 0.0)      # biased variance
    scale = gamma_p * jax.lax.rsqrt(var + EPS)
    shift = beta_p - mean * scale

    # Kernel 2: tiled per-channel normalize.
    out = _bn_scale_shift(y, scale.reshape(1, Cp), shift.reshape(1, Cp), tm=tm_eff)

    # [Mp, Cp] -> [M, Cout] -> NCHW.
    return out[:M, :Cout].reshape(N, Ho, Wo, Cout).transpose(0, 3, 1, 2)


# ----------------------------------------------------------------------------
# Pure-JAX reference (for a correctness spot-check in __main__).
# ----------------------------------------------------------------------------
def _reference(x, w, b, gamma, beta):
    y = jax.lax.conv_general_dilated(
        x, w, window_strides=(2, 2), padding=((1, 1), (1, 1)),
        dimension_numbers=("NCHW", "OIHW", "NCHW"))
    y = y + b.reshape(1, -1, 1, 1)
    y = jnp.maximum(y, 0.0)
    mean = jnp.mean(y, axis=(0, 2, 3), keepdims=True)
    var = jnp.mean((y - mean) ** 2, axis=(0, 2, 3), keepdims=True)
    return ((y - mean) * jax.lax.rsqrt(var + EPS) * gamma.reshape(1, -1, 1, 1)
            + beta.reshape(1, -1, 1, 1))


if __name__ == "__main__":
    key = jax.random.PRNGKey(0)
    kx, kw_, kb = jax.random.split(key, 3)

    N, Cin, H, W = 2, 4, 16, 16
    Cout = 8

    x = jax.random.normal(kx, (N, Cin, H, W), dtype=jnp.float32)
    # Deterministic synthetic parameters (shapes match nn.Conv2d(4, 8, 4, 2, 1)).
    w = jax.random.normal(kw_, (Cout, Cin, 4, 4), dtype=jnp.float32) * 0.1
    b = jax.random.normal(kb, (Cout,), dtype=jnp.float32) * 0.1
    gamma = jnp.ones((Cout,), dtype=jnp.float32)   # BatchNorm2d default weight
    beta = jnp.zeros((Cout,), dtype=jnp.float32)   # BatchNorm2d default bias

    out = convolution_block(x, w, b, gamma, beta)
    jax.block_until_ready(out)
    assert out.shape == (N, Cout, H // 2, W // 2), out.shape

    ref = _reference(x, w, b, gamma, beta)
    max_err = float(jnp.max(jnp.abs(out - ref)))
    assert jnp.allclose(out, ref, atol=1e-3, rtol=1e-3), max_err

    print("KERNEL_OK")
</pallas_src>

<mosaic_0001>
module attributes {stable_mosaic.version = 11 : i64} {
  func.func @_bn_scale_shift_kernel(%arg0: i32, %arg1: memref<128x128xf32, #tpu.memory_space<vmem>>, %arg2: memref<1x128xf32, #tpu.memory_space<vmem>>, %arg3: memref<1x128xf32, #tpu.memory_space<vmem>>, %arg4: memref<128x128xf32, #tpu.memory_space<vmem>>) attributes {dimension_semantics = [#tpu.dimension_semantics<parallel>], iteration_bounds = array<i64: 1>, scalar_prefetch = 0 : i64, scratch_operands = 0 : i64, tpu.core_type = #tpu.core_type<tc>, window_params = [{transform_indices = @transform_0, window_bounds = array<i64: 128, 128>}, {pipeline_mode = #tpu.pipeline_mode<synchronous>, transform_indices = @transform_1, window_bounds = array<i64: 1, 128>}, {pipeline_mode = #tpu.pipeline_mode<synchronous>, transform_indices = @transform_2, window_bounds = array<i64: 1, 128>}, {transform_indices = @transform_3, window_bounds = array<i64: 128, 128>}]} {
    %c0 = arith.constant 0 : index
    %c0_0 = arith.constant 0 : index
    %0 = vector.load %arg1[%c0, %c0_0] : memref<128x128xf32, #tpu.memory_space<vmem>>, vector<128x128xf32>
    %c0_1 = arith.constant 0 : index
    %c0_2 = arith.constant 0 : index
    %1 = vector.load %arg2[%c0_1, %c0_2] : memref<1x128xf32, #tpu.memory_space<vmem>>, vector<1x128xf32>
    %2 = vector.broadcast %1 : vector<1x128xf32> to vector<128x128xf32>
    %3 = arith.mulf %0, %2 : vector<128x128xf32>
    %c0_3 = arith.constant 0 : index
    %c0_4 = arith.constant 0 : index
    %4 = vector.load %arg3[%c0_3, %c0_4] : memref<1x128xf32, #tpu.memory_space<vmem>>, vector<1x128xf32>
    %5 = vector.broadcast %4 : vector<1x128xf32> to vector<128x128xf32>
    %6 = arith.addf %3, %5 : vector<128x128xf32>
    %c0_5 = arith.constant 0 : index
    %c0_6 = arith.constant 0 : index
    %7 = vector.load %arg4[%c0_5, %c0_6] : memref<128x128xf32, #tpu.memory_space<vmem>>, vector<128x128xf32>
    tpu.vector_store %arg4[%c0_5, %c0_6], %6 {strides = array<i32>} : memref<128x128xf32, #tpu.memory_space<vmem>>, vector<128x128xf32>,
    return
  }
  func.func @transform_0(%arg0: i32) -> (i32, i32) {
    %c0_i32 = arith.constant 0 : i32
    %c0_i32_0 = arith.constant 0 : i32
    return %arg0, %c0_i32 : i32, i32
  }
  func.func @transform_1(%arg0: i32) -> (i32, i32) {
    %c0_i32 = arith.constant 0 : i32
    %c0_i32_0 = arith.constant 0 : i32
    %c0_i32_1 = arith.constant 0 : i32
    return %c0_i32, %c0_i32_0 : i32, i32
  }
  func.func @transform_2(%arg0: i32) -> (i32, i32) {
    %c0_i32 = arith.constant 0 : i32
    %c0_i32_0 = arith.constant 0 : i32
    %c0_i32_1 = arith.constant 0 : i32
    return %c0_i32, %c0_i32_0 : i32, i32
  }
  func.func @transform_3(%arg0: i32) -> (i32, i32) {
    %c0_i32 = arith.constant 0 : i32
    %c0_i32_0 = arith.constant 0 : i32
    return %arg0, %c0_i32 : i32, i32
  }
}

module attributes {stable_mosaic.version = 11 : i64} {
  func.func @_conv_relu_stats_kernel(%arg0: i32, %arg1: memref<128x128xf32, #tpu.memory_space<vmem>>, %arg2: memref<128x128xf32, #tpu.memory_space<vmem>>, %arg3: memref<1x128xf32, #tpu.memory_space<vmem>>, %arg4: memref<128x128xf32, #tpu.memory_space<vmem>>, %arg5: memref<1x2x128xf32, #tpu.memory_space<vmem>>) attributes {dimension_semantics = [#tpu.dimension_semantics<parallel>], iteration_bounds = array<i64: 1>, scalar_prefetch = 0 : i64, scratch_operands = 0 : i64, tpu.core_type = #tpu.core_type<tc>, window_params = [{transform_indices = @transform_0, window_bounds = array<i64: 128, 128>}, {pipeline_mode = #tpu.pipeline_mode<synchronous>, transform_indices = @transform_1, window_bounds = array<i64: 128, 128>}, {pipeline_mode = #tpu.pipeline_mode<synchronous>, transform_indices = @transform_2, window_bounds = array<i64: 1, 128>}, {transform_indices = @transform_3, window_bounds = array<i64: 128, 128>}, {transform_indices = @transform_4, window_bounds = array<i64: 1, 2, 128>}]} {
    %c0 = arith.constant 0 : index
    %c0_0 = arith.constant 0 : index
    %0 = vector.load %arg1[%c0, %c0_0] : memref<128x128xf32, #tpu.memory_space<vmem>>, vector<128x128xf32>
    %c0_1 = arith.constant 0 : index
    %c0_2 = arith.constant 0 : index
    %1 = vector.load %arg2[%c0_1, %c0_2] : memref<128x128xf32, #tpu.memory_space<vmem>>, vector<128x128xf32>
    %cst = arith.constant dense<0.000000e+00> : vector<128x128xf32>
    %2 = tpu.matmul %0, %1, %cst {dimension_numbers = #tpu.dot_dimension_numbers<[1], [0], [0], [1], [0, 0, 1, 1], [], []>} : vector<128x128xf32>, vector<128x128xf32>, vector<128x128xf32> -> vector<128x128xf32>
    %c0_3 = arith.constant 0 : index
    %c0_4 = arith.constant 0 : index
    %3 = vector.load %arg3[%c0_3, %c0_4] : memref<1x128xf32, #tpu.memory_space<vmem>>, vector<1x128xf32>
    %4 = vector.broadcast %3 : vector<1x128xf32> to vector<128x128xf32>
    %5 = arith.addf %2, %4 : vector<128x128xf32>
    %cst_5 = arith.constant 0.000000e+00 : f32
    %6 = vector.broadcast %cst_5 : f32 to vector<128x128xf32>
    %7 = arith.maximumf %5, %6 : vector<128x128xf32>
    %c0_6 = arith.constant 0 : index
    %c0_7 = arith.constant 0 : index
    %8 = vector.load %arg4[%c0_6, %c0_7] : memref<128x128xf32, #tpu.memory_space<vmem>>, vector<128x128xf32>
    tpu.vector_store %arg4[%c0_6, %c0_7], %7 {strides = array<i32>} : memref<128x128xf32, #tpu.memory_space<vmem>>, vector<128x128xf32>,
    %c128_i32 = arith.constant 128 : i32
    %9 = arith.muli %arg0, %c128_i32 : i32
    %10 = tpu.iota {dimensions = array<i32: 0>} : vector<128x1xi32>
    %11 = vector.broadcast %9 : i32 to vector<128x1xi32>
    %12 = arith.addi %11, %10 : vector<128x1xi32>
    %c128_i32_8 = arith.constant 128 : i32
    %13 = vector.broadcast %c128_i32_8 : i32 to vector<128x1xi32>
    %14 = arith.cmpi slt, %12, %13 : vector<128x1xi32>
    %cst_9 = arith.constant 0.000000e+00 : f32
    %15 = vector.shape_cast %14 : vector<128x1xi1> to vector<128x1xi1>
    %16 = vector.broadcast %15 : vector<128x1xi1> to vector<128x128xi1>
    %17 = vector.broadcast %cst_9 : f32 to vector<128x128xf32>
    %18 = arith.select %16, %7, %17 : vector<128x128xi1>, vector<128x128xf32>
    %cst_10 = arith.constant dense<0.000000e+00> : vector<128xf32>
    %19 = vector.multi_reduction <add>, %18, %cst_10 [0] : vector<128x128xf32> to vector<128xf32>
    %20 = vector.shape_cast %19 : vector<128xf32> to vector<1x128xf32>
    %21 = arith.mulf %18, %18 : vector<128x128xf32>
    %cst_11 = arith.constant dense<0.000000e+00> : vector<128xf32>
    %22 = vector.multi_reduction <add>, %21, %cst_11 [0] : vector<128x128xf32> to vector<128xf32>
    %23 = vector.shape_cast %22 : vector<128xf32> to vector<1x128xf32>
    %24 = tpu.concatenate %20, %23 in 0 : vector<1x128xf32>, vector<1x128xf32> -> vector<2x128xf32>
    %25 = vector.shape_cast %24 : vector<2x128xf32> to vector<1x2x128xf32>
    %c0_12 = arith.constant 0 : index
    %c0_13 = arith.constant 0 : index
    %c0_14 = arith.constant 0 : index
    %26 = vector.load %arg5[%c0_12, %c0_13, %c0_14] : memref<1x2x128xf32, #tpu.memory_space<vmem>>, vector<1x2x128xf32>
    tpu.vector_store %arg5[%c0_12, %c0_13, %c0_14], %25 {strides = array<i32>} : memref<1x2x128xf32, #tpu.memory_space<vmem>>, vector<1x2x128xf32>,
    return
  }
  func.func @transform_0(%arg0: i32) -> (i32, i32) {
    %c0_i32 = arith.constant 0 : i32
    %c0_i32_0 = arith.constant 0 : i32
    return %arg0, %c0_i32 : i32, i32
  }
  func.func @transform_1(%arg0: i32) -> (i32, i32) {
    %c0_i32 = arith.constant 0 : i32
    %c0_i32_0 = arith.constant 0 : i32
    %c0_i32_1 = arith.constant 0 : i32
    return %c0_i32, %c0_i32_0 : i32, i32
  }
  func.func @transform_2(%arg0: i32) -> (i32, i32) {
    %c0_i32 = arith.constant 0 : i32
    %c0_i32_0 = arith.constant 0 : i32
    %c0_i32_1 = arith.constant 0 : i32
    return %c0_i32, %c0_i32_0 : i32, i32
  }
  func.func @transform_3(%arg0: i32) -> (i32, i32) {
    %c0_i32 = arith.constant 0 : i32
    %c0_i32_0 = arith.constant 0 : i32
    return %arg0, %c0_i32 : i32, i32
  }
  func.func @transform_4(%arg0: i32) -> (i32, i32, i32) {
    %c0_i32 = arith.constant 0 : i32
    %c0_i32_0 = arith.constant 0 : i32
    %c0_i32_1 = arith.constant 0 : i32
    return %arg0, %c0_i32, %c0_i32_0 : i32, i32, i32
  }
}

</mosaic_0001>

<bundles_post_ra>
// kernel: convolution_block.3
= control target key start
LH: loop header
LB: loop body
LE: loop exit
PB: predicated region body
PF: predicated region fallthrough
CT: control target
= control target key end

     0   :  { %s214_s0 = inlined_call_operand.vmem [shape: f32[128,128], index: 0, kind: input, shape index: {}]   ;;  %s215_s1 = inlined_call_operand.vmem [shape: f32[1,128], index: 1, kind: input, shape index: {}]   ;;  %s216_s2 = inlined_call_operand.vmem [shape: f32[1,128], index: 2, kind: input, shape index: {}]   ;;  %s217_s3 = inlined_call_operand.vmem [shape: f32[128,128], index: 3, kind: output, shape index: {}]  }
   0x1   :  { %v14_v0 = vld [vmem:[%s214_s0] sm:$0xff]  ;;  %v15_v3 = vld [vmem:[%s214_s0 + $0x8] sm:$0xff]  ;;  %v16_v6 = vld [vmem:[%s214_s0 + $0x10] sm:$0xff] }
   0x2   :  { %v90_v1 = vld [vmem:[%s215_s1] ss:$0 sm:$0xff]  ;;  %v17_v7 = vld [vmem:[%s214_s0 + $0x18] sm:$0xff]  ;;  %v19_v12 = vld [vmem:[%s214_s0 + $0x28] sm:$0xff] }
   0x3   :  { %v91_v2 = vld [vmem:[%s216_s2] ss:$0 sm:$0xff]  ;;  %v34_v4 = vmul.f32 %v90_v1, %v14_v0  ;;  %v35_v5 = vmul.f32 %v90_v1, %v15_v3  ;;  %v36_v9 = vmul.f32 %v90_v1, %v16_v6  ;;  %v37_v10 = vmul.f32 %v90_v1, %v17_v7  ;;  %v20_v13 = vld [vmem:[%s214_s0 + $0x30] sm:$0xff]  ;;  %v21_v14 = vld [vmem:[%s214_s0 + $0x38] sm:$0xff] }
   0x4   :  { %v18_v8 = vld [vmem:[%s214_s0 + $0x20] sm:$0xff]  ;;  %v39_v17 = vmul.f32 %v90_v1, %v19_v12  ;;  %v40_v18 = vmul.f32 %v90_v1, %v20_v13  ;;  %v23_v20 = vld [vmem:[%s214_s0 + $0x48] sm:$0xff]  ;;  %v41_v23 = vmul.f32 %v90_v1, %v21_v14  ;;  %v24_v24 = vld [vmem:[%s214_s0 + $0x50] sm:$0xff] }
   0x5   :  { %v38_v11 = vmul.f32 %v90_v1, %v18_v8  ;;  %v54_v15 = vadd.f32 %v91_v2, %v34_v4  ;;  %v55_v16 = vadd.f32 %v91_v2, %v35_v5  ;;  %v22_v19 = vld [vmem:[%s214_s0 + $0x40] sm:$0xff]  ;;  %v56_v21 = vadd.f32 %v91_v2, %v36_v9  ;;  %v25_v27 = vld [vmem:[%s214_s0 + $0x58] sm:$0xff]  ;;  %v27_v33 = vld [vmem:[%s214_s0 + $0x68] sm:$0xff] }
   0x6   :  { %v57_v22 = vadd.f32 %v91_v2, %v37_v10  ;;  %v42_v26 = vmul.f32 %v90_v1, %v22_v19  ;;  %v59_v28 = vadd.f32 %v91_v2, %v39_v17  ;;  %v43_v29 = vmul.f32 %v90_v1, %v23_v20  ;;  %v26_v30 = vld [vmem:[%s214_s0 + $0x60] sm:$0xff]  ;;  %v28_v36 = vld [vmem:[%s214_s0 + $0x70] sm:$0xff]  ;;  %v29_v39 = vld [vmem:[%s214_s0 + $0x78] sm:$0xff] }
   0x7   :  { %70 = vst [vmem:[%s217_s3] sm:$0xff] %v54_v15  ;;  %v58_v25 = vadd.f32 %v91_v2, %v38_v11  ;;  %v60_v31 = vadd.f32 %v91_v2, %v40_v18  ;;  %v44_v32 = vmul.f32 %v90_v1, %v24_v24  ;;  %v61_v34 = vadd.f32 %v91_v2, %v41_v23 }
   0x8   :  { %71 = vst [vmem:[%s217_s3 + $0x8] sm:$0xff] %v55_v16  ;;  %v45_v35 = vmul.f32 %v90_v1, %v25_v27  ;;  %v62_v37 = vadd.f32 %v91_v2, %v42_v26  ;;  %v46_v38 = vmul.f32 %v90_v1, %v26_v30  ;;  %v63_v40 = vadd.f32 %v91_v2, %v43_v29 }
   0x9   :  { %72 = vst [vmem:[%s217_s3 + $0x10] sm:$0xff] %v56_v21  ;;  %v47_v41 = vmul.f32 %v90_v1, %v27_v33  ;;  %v64_v42 = vadd.f32 %v91_v2, %v44_v32  ;;  %v48_v43 = vmul.f32 %v90_v1, %v28_v36  ;;  %v49_v45 = vmul.f32 %v90_v1, %v29_v39 }
   0xa   :  { %73 = vst [vmem:[%s217_s3 + $0x18] sm:$0xff] %v57_v22  ;;  %v65_v44 = vadd.f32 %v91_v2, %v45_v35  ;;  %v66_v46 = vadd.f32 %v91_v2, %v46_v38 }
   0xb   :  { %74 = vst [vmem:[%s217_s3 + $0x20] sm:$0xff] %v58_v25  ;;  %v67_v47 = vadd.f32 %v91_v2, %v47_v41  ;;  %v68_v48 = vadd.f32 %v91_v2, %v48_v43  ;;  %v69_v49 = vadd.f32 %v91_v2, %v49_v45 }
   0xc   :  { %75 = vst [vmem:[%s217_s3 + $0x28] sm:$0xff] %v59_v28 }
   0xd   :  { %76 = vst [vmem:[%s217_s3 + $0x30] sm:$0xff] %v60_v31 }
   0xe   :  { %77 = vst [vmem:[%s217_s3 + $0x38] sm:$0xff] %v61_v34 }
   0xf   :  { %78 = vst [vmem:[%s217_s3 + $0x40] sm:$0xff] %v62_v37 }
  0x10   :  { %79 = vst [vmem:[%s217_s3 + $0x48] sm:$0xff] %v63_v40 }
  0x11   :  { %80 = vst [vmem:[%s217_s3 + $0x50] sm:$0xff] %v64_v42 }
  0x12   :  { %81 = vst [vmem:[%s217_s3 + $0x58] sm:$0xff] %v65_v44 }
  0x13   :  { %82 = vst [vmem:[%s217_s3 + $0x60] sm:$0xff] %v66_v46 }
  0x14   :  { %83 = vst [vmem:[%s217_s3 + $0x68] sm:$0xff] %v67_v47 }
  0x15   :  { %84 = vst [vmem:[%s217_s3 + $0x70] sm:$0xff] %v68_v48 }
  0x16   :  { %85 = vst [vmem:[%s217_s3 + $0x78] sm:$0xff] %v69_v49 }

// kernel: convolution_block.2
= control target key start
LH: loop header
LB: loop body
LE: loop exit
PB: predicated region body
PF: predicated region fallthrough
CT: control target
= control target key end

     0   :  { %vm306_vm0 = vcmask 1040384   ;;  %s577_s1 = inlined_call_operand.vmem [shape: f32[128,128], index: 1, kind: input, shape index: {}]   ;;  %s578_s2 = inlined_call_operand.vmem [shape: f32[1,128], index: 2, kind: input, shape index: {}]   ;;  %s579_s0 = inlined_call_operand.vmem [shape: f32[128,128], index: 0, kind: input, shape index: {}]   ;;  %s580_s3 = inlined_call_operand.vmem [shape: f32[128,128], index: 3, kind: output, shape index: {0}]   ;;  %s581_s4 = inlined_call_operand.vmem [shape: f32[1,2,128], index: 4, kind: output, shape index: {1}]  }
   0x1   :  { %v47_v0 = vld [vmem:[%s577_s1 + $0x78] sm:$0xff]  ;;  %v46_v1 = vld [vmem:[%s577_s1 + $0x70] sm:$0xff]  ;;  %v45_v2 = vld [vmem:[%s577_s1 + $0x68] sm:$0xff] }
   0x2   :  { %52 = vmatpush.msra.mxu0 %v47_v0  ;;  %317 = vmatpush.msra.mxu1 %v47_v0  ;;  %v44_v3 = vld [vmem:[%s577_s1 + $0x60] sm:$0xff]  ;;  %v43_v4 = vld [vmem:[%s577_s1 + $0x58] sm:$0xff]  ;;  %v42_v5 = vld [vmem:[%s577_s1 + $0x50] sm:$0xff] }
   0x3   :  { %318 = vmatpush.msra.mxu2 %v47_v0  ;;  %319 = vmatpush.msra.mxu3 %v47_v0  ;;  %v41_v6 = vld [vmem:[%s577_s1 + $0x48] sm:$0xff]  ;;  %v40_v7 = vld [vmem:[%s577_s1 + $0x40] sm:$0xff]  ;;  %v39_v8 = vld [vmem:[%s577_s1 + $0x38] sm:$0xff] }
   0x4   :  { %53 = vmatpush.msra.mxu0 %v46_v1  ;;  %320 = vmatpush.msra.mxu1 %v46_v1  ;;  %v38_v9 = vld [vmem:[%s577_s1 + $0x30] sm:$0xff]  ;;  %v37_v10 = vld [vmem:[%s577_s1 + $0x28] sm:$0xff]  ;;  %v36_v11 = vld [vmem:[%s577_s1 + $0x20] sm:$0xff] }
   0x5   :  { %321 = vmatpush.msra.mxu2 %v46_v1  ;;  %322 = vmatpush.msra.mxu3 %v46_v1  ;;  %v35_v12 = vld [vmem:[%s577_s1 + $0x18] sm:$0xff]  ;;  %v34_v13 = vld [vmem:[%s577_s1 + $0x10] sm:$0xff]  ;;  %v33_v14 = vld [vmem:[%s577_s1 + $0x8] sm:$0xff] }
   0x6   :  { %54 = vmatpush.msra.mxu0 %v45_v2  ;;  %323 = vmatpush.msra.mxu1 %v45_v2  ;;  %v32_v15 = vld [vmem:[%s577_s1] sm:$0xff]  ;;  %v17_v20 = vld [vmem:[%s579_s0 + $0x8] sm:$0xff]  ;;  %v18_v24 = vld [vmem:[%s579_s0 + $0x10] sm:$0xff] }
   0x7   :  { %324 = vmatpush.msra.mxu2 %v45_v2  ;;  %325 = vmatpush.msra.mxu3 %v45_v2  ;;  %v16_v16 = vld [vmem:[%s579_s0] sm:$0xff]  ;;  %v21_v21 = vld [vmem:[%s579_s0 + $0x28] sm:$0xff]  ;;  %v22_v25 = vld [vmem:[%s579_s0 + $0x30] sm:$0xff] }
   0x8   :  { %55 = vmatpush.msra.mxu0 %v44_v3  ;;  %326 = vmatpush.msra.mxu1 %v44_v3  ;;  %v20_v17 = vld [vmem:[%s579_s0 + $0x20] sm:$0xff]  ;;  %v25_v22 = vld [vmem:[%s579_s0 + $0x48] sm:$0xff]  ;;  %v26_v26 = vld [vmem:[%s579_s0 + $0x50] sm:$0xff] }
   0x9   :  { %327 = vmatpush.msra.mxu2 %v44_v3  ;;  %328 = vmatpush.msra.mxu3 %v44_v3  ;;  %v24_v18 = vld [vmem:[%s579_s0 + $0x40] sm:$0xff]  ;;  %v29_v23 = vld [vmem:[%s579_s0 + $0x68] sm:$0xff]  ;;  %v30_v27 = vld [vmem:[%s579_s0 + $0x70] sm:$0xff] }
   0xa   :  { %56 = vmatpush.msra.mxu0 %v43_v4  ;;  %329 = vmatpush.msra.mxu1 %v43_v4  ;;  %v28_v19 = vld [vmem:[%s579_s0 + $0x60] sm:$0xff]  ;;  %v19_v28 = vld [vmem:[%s579_s0 + $0x18] sm:$0xff] }
   0xb   :  { %330 = vmatpush.msra.mxu2 %v43_v4  ;;  %331 = vmatpush.msra.mxu3 %v43_v4  ;;  %v23_v29 = vld [vmem:[%s579_s0 + $0x38] sm:$0xff]  ;;  %v490_v32 = vld [vmem:[%s578_s2] ss:$0 sm:$0xff] }
   0xc   :  { %57 = vmatpush.msra.mxu0 %v42_v5  ;;  %332 = vmatpush.msra.mxu1 %v42_v5  ;;  %v27_v30 = vld [vmem:[%s579_s0 + $0x58] sm:$0xff] }
   0xd   :  { %333 = vmatpush.msra.mxu2 %v42_v5  ;;  %334 = vmatpush.msra.mxu3 %v42_v5  ;;  %v31_v31 = vld [vmem:[%s579_s0 + $0x78] sm:$0xff] }
   0xe   :  { %58 = vmatpush.msra.mxu0 %v41_v6  ;;  %335 = vmatpush.msra.mxu1 %v41_v6 }
   0xf   :  { %336 = vmatpush.msra.mxu2 %v41_v6  ;;  %337 = vmatpush.msra.mxu3 %v41_v6 }
  0x10   :  { %59 = vmatpush.msra.mxu0 %v40_v7  ;;  %338 = vmatpush.msra.mxu1 %v40_v7 }
  0x11   :  { %339 = vmatpush.msra.mxu2 %v40_v7  ;;  %340 = vmatpush.msra.mxu3 %v40_v7 }
  0x12   :  { %60 = vmatpush.msra.mxu0 %v39_v8  ;;  %341 = vmatpush.msra.mxu1 %v39_v8 }
  0x13   :  { %342 = vmatpush.msra.mxu2 %v39_v8  ;;  %343 = vmatpush.msra.mxu3 %v39_v8 }
  0x14   :  { %61 = vmatpush.msra.mxu0 %v38_v9  ;;  %344 = vmatpush.msra.mxu1 %v38_v9 }
  0x15   :  { %345 = vmatpush.msra.mxu2 %v38_v9  ;;  %346 = vmatpush.msra.mxu3 %v38_v9 }
  0x16   :  { %62 = vmatpush.msra.mxu0 %v37_v10  ;;  %347 = vmatpush.msra.mxu1 %v37_v10 }
  0x17   :  { %348 = vmatpush.msra.mxu2 %v37_v10  ;;  %349 = vmatpush.msra.mxu3 %v37_v10 }
  0x18   :  { %63 = vmatpush.msra.mxu0 %v36_v11  ;;  %350 = vmatpush.msra.mxu1 %v36_v11 }
  0x19   :  { %351 = vmatpush.msra.mxu2 %v36_v11  ;;  %352 = vmatpush.msra.mxu3 %v36_v11 }
  0x1a   :  { %64 = vmatpush.msra.mxu0 %v35_v12  ;;  %353 = vmatpush.msra.mxu1 %v35_v12 }
  0x1b   :  { %354 = vmatpush.msra.mxu2 %v35_v12  ;;  %355 = vmatpush.msra.mxu3 %v35_v12 }
  0x1c   :  { %65 = vmatpush.msra.mxu0 %v34_v13  ;;  %356 = vmatpush.msra.mxu1 %v34_v13 }
  0x1d   :  { %357 = vmatpush.msra.mxu2 %v34_v13  ;;  %358 = vmatpush.msra.mxu3 %v34_v13 }
  0x1e   :  { %66 = vmatpush.msra.mxu0 %v33_v14  ;;  %359 = vmatpush.msra.mxu1 %v33_v14 }
  0x1f   :  { %360 = vmatpush.msra.mxu2 %v33_v14  ;;  %361 = vmatpush.msra.mxu3 %v33_v14 }
  0x20   :  { %67 = vmatpush.msra.mxu0 %v32_v15  ;;  %362 = vmatpush.msra.mxu1 %v32_v15 }
  0x21   :  { %68 = vmatmul.f32.vlgmr.msra.gmra.mxu0 %v16_v16  ;;  %80 = vmatmul.f32.vlgmr.msra.gmra.mxu1 %v20_v17 }
  0x22   :  { %363 = vmatpush.msra.mxu2 %v32_v15  ;;  %364 = vmatpush.msra.mxu3 %v32_v15 }
  0x23   :  { %92 = vmatmul.f32.vlgmr.msra.gmra.mxu2 %v24_v18  ;;  %104 = vmatmul.f32.vlgmr.msra.gmra.mxu3 %v28_v19 }
  0x29   :  { %71 = vmatmul.f32.gmra.mxu0 %v17_v20  ;;  %83 = vmatmul.f32.gmra.mxu1 %v21_v21 }
  0x2b   :  { %95 = vmatmul.f32.gmra.mxu2 %v25_v22  ;;  %107 = vmatmul.f32.gmra.mxu3 %v29_v23 }
  0x31   :  { %74 = vmatmul.f32.gmra.mxu0 %v18_v24  ;;  %86 = vmatmul.f32.gmra.mxu1 %v22_v25 }
  0x33   :  { %98 = vmatmul.f32.gmra.mxu2 %v26_v26  ;;  %110 = vmatmul.f32.gmra.mxu3 %v30_v27 }
  0x39   :  { %77 = vmatmul.f32.gmra.mxu0 %v19_v28  ;;  %89 = vmatmul.f32.gmra.mxu1 %v23_v29 }
  0x3b   :  { %101 = vmatmul.f32.gmra.mxu2 %v27_v30  ;;  %113 = vmatmul.f32.gmra.mxu3 %v31_v31 }
  0x9e   :  { %v69_v33 = vpop.f32.mrf.mxu0  ;;  %v81_v34 = vpop.f32.mrf.mxu1 }
  0x9f   :  { %v70_v35 = vadd.f32 %v490_v32, %v69_v33  ;;  %v82_v36 = vadd.f32 %v490_v32, %v81_v34 }
  0xa1   :  { %v117_v37 = vmax.f32 %v70_v35, 0.0  ;;  %v121_v38 = vmax.f32 %v82_v36, 0.0 }
  0xa3   :  { %133 = vst [vmem:[%s580_s3] sm:$0xff] %v117_v37  ;;  %v269_v0 = vmul.f32 %v117_v37, %v117_v37  ;;  %v273_v20 = vmul.f32 %v121_v38, %v121_v38 }
  0xa4   :  { %137 = vst [vmem:[%s580_s3 + $0x20] sm:$0xff] %v121_v38 }
  0xa6   :  { %v72_v39 = vpop.f32.mrf.mxu0  ;;  %v84_v40 = vpop.f32.mrf.mxu1 }
  0xa7   :  { %v73_v41 = vadd.f32 %v490_v32, %v72_v39  ;;  %v85_v42 = vadd.f32 %v490_v32, %v84_v40  ;;  %v93_v43 = vpop.f32.mrf.mxu2  ;;  %v105_v44 = vpop.f32.mrf.mxu3 }
  0xa8   :  { %v94_v45 = vadd.f32 %v490_v32, %v93_v43  ;;  %v106_v46 = vadd.f32 %v490_v32, %v105_v44 }
  0xa9   :  { %v118_v47 = vmax.f32 %v73_v41, 0.0  ;;  %v122_v48 = vmax.f32 %v85_v42, 0.0 }
  0xaa   :  { %v504_v49 = vmax.f32 %v94_v45, 0.0  ;;  %v506_v50 = vmax.f32 %v106_v46, 0.0 }
  0xab   :  { %134 = vst [vmem:[%s580_s3 + $0x8] sm:$0xff] %v118_v47  ;;  %v270_v63 = vmul.f32 %v118_v47, %v118_v47  ;;  %v248_v3 = vadd.f32 %v118_v47, %v117_v37  ;;  %v274_v23 = vmul.f32 %v122_v48, %v122_v48 }
  0xac   :  { %138 = vst [vmem:[%s580_s3 + $0x28] sm:$0xff] %v122_v48  ;;  %v277_v39 = vmul.f32 %v504_v49, %v504_v49 }
  0xad   :  { %141 = vst [vmem:[%s580_s3 + $0x40] sm:$0xff] %v504_v49  ;;  %v285_v11 = vadd.f32 %v270_v63, %v269_v0 }
  0xae   :  { %v75_v51 = vpop.f32.mrf.mxu0  ;;  %v87_v52 = vpop.f32.mrf.mxu1  ;;  %145 = vst [vmem:[%s580_s3 + $0x60] sm:$0xff] %v506_v50 }
  0xaf   :  { %v76_v53 = vadd.f32 %v490_v32, %v75_v51  ;;  %v88_v54 = vadd.f32 %v490_v32, %v87_v52  ;;  %v96_v55 = vpop.f32.mrf.mxu2  ;;  %v108_v56 = vpop.f32.mrf.mxu3  ;;  %v281_v52 = vmul.f32 %v506_v50, %v506_v50 }
  0xb0   :  { %v97_v57 = vadd.f32 %v490_v32, %v96_v55  ;;  %v109_v58 = vadd.f32 %v490_v32, %v108_v56 }
  0xb1   :  { %v119_v59 = vmax.f32 %v76_v53, 0.0  ;;  %v123_v60 = vmax.f32 %v88_v54, 0.0 }
  0xb2   :  { %v126_v61 = vmax.f32 %v97_v57, 0.0  ;;  %v526_v62 = vmax.f32 %v109_v58, 0.0 }
  0xb3   :  { %135 = vst [vmem:[%s580_s3 + $0x10] sm:$0xff] %v119_v59  ;;  %v271_v4 = vmul.f32 %v119_v59, %v119_v59  ;;  %v249_v12 = vadd.f32 %v248_v3, %v119_v59  ;;  %v275_v31 = vmul.f32 %v123_v60, %v123_v60 }
  0xb4   :  { %139 = vst [vmem:[%s580_s3 + $0x30] sm:$0xff] %v123_v60  ;;  %v282_v54 = vmul.f32 %v526_v62, %v526_v62 }
  0xb5   :  { %142 = vst [vmem:[%s580_s3 + $0x48] sm:$0xff] %v126_v61  ;;  %v286_v17 = vadd.f32 %v285_v11, %v271_v4 }
  0xb6   :  { %v78_v1 = vpop.f32.mrf.mxu0  ;;  %v90_v2 = vpop.f32.mrf.mxu1  ;;  %146 = vst [vmem:[%s580_s3 + $0x68] sm:$0xff] %v526_v62 }
  0xb7   :  { %v79_v5 = vadd.f32 %v490_v32, %v78_v1  ;;  %v91_v6 = vadd.f32 %v490_v32, %v90_v2  ;;  %v99_v7 = vpop.f32.mrf.mxu2  ;;  %v111_v8 = vpop.f32.mrf.mxu3 }
  0xb8   :  { %v100_v9 = vadd.f32 %v490_v32, %v99_v7  ;;  %v112_v10 = vadd.f32 %v490_v32, %v111_v8 }
  0xb9   :  { %v120_v13 = vmax.f32 %v79_v5, 0.0  ;;  %v124_v14 = vmax.f32 %v91_v6, 0.0 }
  0xba   :  { %v127_v15 = vmax.f32 %v100_v9, 0.0  ;;  %v131_v16 = vmax.f32 %v112_v10, 0.0 }
  0xbb   :  { %136 = vst [vmem:[%s580_s3 + $0x18] sm:$0xff] %v120_v13  ;;  %v250_v18 = vadd.f32 %v249_v12, %v120_v13  ;;  %v272_v19 = vmul.f32 %v120_v13, %v120_v13  ;;  %v276_v34 = vmul.f32 %v124_v14, %v124_v14 }
  0xbc   :  { %140 = vst [vmem:[%s580_s3 + $0x38] sm:$0xff] %v124_v14  ;;  %v279_v45 = vmul.f32 %v127_v15, %v127_v15  ;;  %v283_v58 = vmul.f32 %v131_v16, %v131_v16 }
  0xbd   :  { %v251_v21 = vadd.f32 %v250_v18, %v121_v38  ;;  %v287_v22 = vadd.f32 %v286_v17, %v272_v19  ;;  %143 = vst [vmem:[%s580_s3 + $0x50] sm:$0xff] %v127_v15 }
  0xbe   :  { %147 = vst [vmem:[%s580_s3 + $0x70] sm:$0xff] %v131_v16 }
  0xbf   :  { %v288_v24 = vadd.f32 %v287_v22, %v273_v20  ;;  %v252_v25 = vadd.f32 %v251_v21, %v122_v48  ;;  %v102_v26 = vpop.f32.mrf.mxu2  ;;  %v114_v27 = vpop.f32.mrf.mxu3 }
  0xc0   :  { %v103_v28 = vadd.f32 %v490_v32, %v102_v26  ;;  %v115_v29 = vadd.f32 %v490_v32, %v114_v27  ;;  %v278_v32 = vmul.f32 %v126_v61, %v126_v61 }
  0xc1   :  { %v253_v30 = vadd.f32 %v252_v25, %v123_v60  ;;  %v289_v33 = vadd.f32 %v288_v24, %v274_v23 }
  0xc2   :  { %v128_v35 = vmax.f32 %v103_v28, 0.0  ;;  %v132_v36 = vmax.f32 %v115_v29, 0.0 }
  0xc3   :  { %v290_v37 = vadd.f32 %v289_v33, %v275_v31  ;;  %v254_v38 = vadd.f32 %v253_v30, %v124_v14 }
  0xc4   :  { %144 = vst [vmem:[%s580_s3 + $0x58] sm:$0xff] %v128_v35  ;;  %v280_v47 = vmul.f32 %v128_v35, %v128_v35  ;;  %v284_v60 = vmul.f32 %v132_v36, %v132_v36 }
  0xc5   :  { %v255_v40 = vadd.f32 %v254_v38, %v504_v49  ;;  %v291_v41 = vadd.f32 %v290_v37, %v276_v34  ;;  %148 = vst [vmem:[%s580_s3 + $0x78] sm:$0xff] %v132_v36 }
  0xc7   :  { %v292_v42 = vadd.f32 %v291_v41, %v277_v39  ;;  %v256_v43 = vadd.f32 %v255_v40, %v126_v61 }
  0xc9   :  { %v257_v44 = vadd.f32 %v256_v43, %v127_v15  ;;  %v293_v46 = vadd.f32 %v292_v42, %v278_v32 }
  0xcb   :  { %v294_v48 = vadd.f32 %v293_v46, %v279_v45  ;;  %v258_v51 = vadd.f32 %v257_v44, %v128_v35 }
  0xcd   :  { %v259_v53 = vadd.f32 %v258_v51, %v506_v50  ;;  %v295_v49 = vadd.f32 %v294_v48, %v280_v47 }
  0xcf   :  { %v296_v55 = vadd.f32 %v295_v49, %v281_v52  ;;  %v260_v56 = vadd.f32 %v259_v53, %v526_v62 }
  0xd1   :  { %v261_v57 = vadd.f32 %v260_v56, %v131_v16  ;;  %v297_v59 = vadd.f32 %v296_v55, %v282_v54 }
  0xd3   :  { %v298_v61 = vadd.f32 %v297_v59, %v283_v58  ;;  %v262_v63 = vadd.f32 %v261_v57, %v132_v36 }
  0xd5   :  { %v263_v0 = vrot.slane %v262_v63, 4  ;;  %v299_v1 = vadd.f32 %v298_v61, %v284_v60 }
  0xd7   :  { %v264_v2 = vadd.f32 %v263_v0, %v262_v63  ;;  %v300_v3 = vrot.slane %v299_v1, 4 }
  0xd9   :  { %v265_v4 = vrot.slane %v264_v2, 2  ;;  %v301_v5 = vadd.f32 %v300_v3, %v299_v1 }
  0xdb   :  { %v266_v50 = vadd.f32 %v265_v4, %v264_v2  ;;  %v302_v6 = vrot.slane %v301_v5, 2 }
  0xdd   :  { %v267_v7 = vrot.slane %v266_v50, 1  ;;  %v303_v8 = vadd.f32 %v302_v6, %v301_v5 }
  0xdf   :  { %v304_v9 = vrot.slane %v303_v8, 1  ;;  %v268_v10 = vadd.f32 %v267_v7, %v266_v50 }
  0xe1   :  { %v305_v62 = vadd.f32 %v304_v9, %v303_v8 }
  0xe3   :  { %v307_v11 = vsel %vm306_vm0, %v268_v10, %v305_v62 }
  0xe4   :  { %308 = vst [vmem:[%s581_s4] sm:$0x3] %v307_v11 }

</bundles_post_ra>
